<compile_context>
chip_gen: v5e
topology: v5e:2x2
jax: 0.10.0
libtpu: 0.0.40
codegen_flags: <defaults>
</compile_context>

<pallas_src>
import jax
import jax.numpy as jnp
import numpy as np
from jax import lax
from jax.experimental import pallas as pl
from jax.experimental.pallas import tpu as pltpu


# ------------------------------ Pallas kernel ---------------------------------

def _image_attention_kernel(dims_ref,                      # scalar prefetch (SMEM): (B,) int32
                            img_ref, q_ref,                # (1,K,D) bf16, (1,1,Dq) bf16
                            wi_ref, bi_ref,                # (D,H) bf16, (1,H) f32
                            wq_ref, bq_ref,                # (Dq,H) bf16, (1,H) f32
                            wt_ref, bt_ref,                # (H,G) bf16, (1,G) f32
                            emb_ref, att_ref, raw_ref):    # (1,G,D), (1,K,G), (1,K,G) f32
    b = pl.program_id(0)
    img_bf = img_ref[0]                                    # (K, D) bf16
    q_bf = q_ref[0]                                        # (1, Dq) bf16

    # ReLU(weight_norm(Linear(x))) branches; weight norm folded into effective W.
    img_fa = jnp.maximum(
        jnp.dot(img_bf, wi_ref[...], preferred_element_type=jnp.float32)
        + bi_ref[...], 0.0)                                # (K, H) f32
    q_fa = jnp.maximum(
        jnp.dot(q_bf, wq_ref[...], preferred_element_type=jnp.float32)
        + bq_ref[...], 0.0)                                # (1, H) f32

    # non_linear_element_multiply modal combine (dropout is eval-mode identity).
    joint = img_fa * q_fa                                  # (K, H) f32

    raw = jnp.dot(joint.astype(jnp.bfloat16), wt_ref[...],
                  preferred_element_type=jnp.float32) + bt_ref[...]   # (K, G) f32
    raw_ref[0] = raw

    # Softmax over the location axis; EUP approx reciprocal for the denominator.
    m = jnp.max(raw, axis=0, keepdims=True)                # (1, G)
    e = jnp.exp(raw - m)
    att = e * pl.reciprocal(jnp.sum(e, axis=0, keepdims=True), approx=True)

    # Mask padded locations (loc >= image_dims[b]) and renormalize,
    # matching pythia TopDownAttention (EPS = 1e-8, +1 if the masked sum is 0).
    K, G = att.shape
    valid = lax.broadcasted_iota(jnp.int32, (K, G), 0) < dims_ref[b]
    att = jnp.where(valid, att, 0.0)
    s = jnp.sum(att, axis=0, keepdims=True)
    s = s + (s == 0.0).astype(jnp.float32) + 1e-8
    att = att * pl.reciprocal(s, approx=True)
    att_ref[0] = att

    # bmm(attention^T, image_feat): contract over locations directly (no XLU transpose).
    emb = lax.dot_general(att.astype(jnp.bfloat16), img_bf,
                          dimension_numbers=(((0,), (0,)), ((), ())),
                          preferred_element_type=jnp.float32)          # (G, D) f32
    emb_ref[0] = emb


# --------------------------------- Wrapper -------------------------------------

def image_embedding(image_feat, question_embedding, image_dims, params):
    """image_feat: (B, K, D) f32, question_embedding: (B, Dq) f32, image_dims: (B,) int.

    Returns (image_embedding (B, G*D), attention (B, K, G), raw_att (B, K, G)).
    """
    B, K, D = image_feat.shape
    Dq = question_embedding.shape[-1]
    wi, bi = params['fa_image']     # (H, D), (H,)
    wq, bq = params['fa_txt']       # (H, Dq), (H,)
    wt, bt = params['transform']    # (G, H), (G,)
    H = wi.shape[0]
    G = wt.shape[0]

    # bf16 matmul operands (weights pre-transposed so kernels do x @ W).
    img_bf = image_feat.astype(jnp.bfloat16)
    q_bf = question_embedding.astype(jnp.bfloat16).reshape(B, 1, Dq)
    wi_t = jnp.transpose(wi).astype(jnp.bfloat16)          # (D, H)
    wq_t = jnp.transpose(wq).astype(jnp.bfloat16)          # (Dq, H)
    wt_t = jnp.transpose(wt).astype(jnp.bfloat16)          # (H, G)

    grid_spec = pltpu.PrefetchScalarGridSpec(
        num_scalar_prefetch=1,                             # image_dims -> SMEM
        grid=(B,),
        in_specs=[
            pl.BlockSpec((1, K, D), lambda b, dims: (b, 0, 0)),   # image features
            pl.BlockSpec((1, 1, Dq), lambda b, dims: (b, 0, 0)),  # question embedding
            pl.BlockSpec((D, H), lambda b, dims: (0, 0)),         # W_image^T
            pl.BlockSpec((1, H), lambda b, dims: (0, 0)),         # b_image
            pl.BlockSpec((Dq, H), lambda b, dims: (0, 0)),        # W_txt^T
            pl.BlockSpec((1, H), lambda b, dims: (0, 0)),         # b_txt
            pl.BlockSpec((H, G), lambda b, dims: (0, 0)),         # W_transform^T
            pl.BlockSpec((1, G), lambda b, dims: (0, 0)),         # b_transform
        ],
        out_specs=[
            pl.BlockSpec((1, G, D), lambda b, dims: (b, 0, 0)),   # per-glimpse embedding
            pl.BlockSpec((1, K, G), lambda b, dims: (b, 0, 0)),   # attention
            pl.BlockSpec((1, K, G), lambda b, dims: (b, 0, 0)),   # raw logits
        ],
    )

    emb, att, raw = pl.pallas_call(
        _image_attention_kernel,
        out_shape=(
            jax.ShapeDtypeStruct((B, G, D), jnp.float32),
            jax.ShapeDtypeStruct((B, K, G), jnp.float32),
            jax.ShapeDtypeStruct((B, K, G), jnp.float32),
        ),
        grid_spec=grid_spec,
        compiler_params=pltpu.CompilerParams(
            dimension_semantics=("parallel",),             # batch axis -> both v7x TCs
            vmem_limit_bytes=32 * 1024 * 1024,             # v7x-safe explicit budget
        ),
    )(image_dims.astype(jnp.int32), img_bf, q_bf,
      wi_t, bi.reshape(1, H), wq_t, bq.reshape(1, H), wt_t, bt.reshape(1, G))

    # torch: tmp_embedding.view(batch_size, -1)  (free metadata reshape here).
    # TODO(synk): extra['order_vectors'] concat path not implemented (default extra={} -> None).
    return emb.reshape(B, G * D), att, raw


# ----------------------- Plain-JAX reference (f32 check) -----------------------

def reference(image_feat, question_embedding, image_dims, params):
    wi, bi = params['fa_image']
    wq, bq = params['fa_txt']
    wt, bt = params['transform']
    img_fa = jax.nn.relu(jnp.einsum('bkd,hd->bkh', image_feat, wi) + bi)
    q_fa = jax.nn.relu(question_embedding @ wq.T + bq)
    joint = img_fa * q_fa[:, None, :]
    raw = jnp.einsum('bkh,gh->bkg', joint, wt) + bt
    att = jax.nn.softmax(raw, axis=1)
    K = image_feat.shape[1]
    valid = jnp.arange(K)[None, :, None] < image_dims[:, None, None].astype(jnp.int32)
    att = jnp.where(valid, att, 0.0)
    s = jnp.sum(att, axis=1, keepdims=True)
    s = s + (s == 0.0).astype(jnp.float32) + 1e-8
    att = att / s
    emb = jnp.einsum('bkg,bkd->bgd', att, image_feat)
    return emb.reshape(image_feat.shape[0], -1), att, raw


# ------------------------------ Parameters -------------------------------------

def init_params(key, *, img_dim, question_dim, hidden_dim, num_glimpses):
    k1, k2, k3, k4, k5, k6 = jax.random.split(key, 6)
    s_i = 1.0 / np.sqrt(img_dim)
    s_q = 1.0 / np.sqrt(question_dim)
    s_t = 1.0 / np.sqrt(hidden_dim)
    return dict(
        fa_image=(jax.random.uniform(k1, (hidden_dim, img_dim), jnp.float32, -s_i, s_i),
                  jax.random.uniform(k2, (hidden_dim,), jnp.float32, -s_i, s_i)),
        fa_txt=(jax.random.uniform(k3, (hidden_dim, question_dim), jnp.float32, -s_q, s_q),
                jax.random.uniform(k4, (hidden_dim,), jnp.float32, -s_q, s_q)),
        transform=(jax.random.uniform(k5, (num_glimpses, hidden_dim), jnp.float32, -s_t, s_t),
                   jax.random.uniform(k6, (num_glimpses,), jnp.float32, -s_t, s_t)),
    )


# --------------------------------- Main -----------------------------------------

if __name__ == "__main__":
    B, K, D_IMG, D_Q, HIDDEN, GLIMPSES = 2, 16, 64, 32, 128, 2

    key = jax.random.PRNGKey(0)
    key, k_img, k_q, k_p = jax.random.split(key, 4)
    image_feat = jax.random.normal(k_img, (B, K, D_IMG), jnp.float32)
    question_emb = jax.random.normal(k_q, (B, D_Q), jnp.float32)
    image_dims = jnp.array([K, 11], jnp.int32)     # second sample has padded locations
    params = init_params(k_p, img_dim=D_IMG, question_dim=D_Q,
                         hidden_dim=HIDDEN, num_glimpses=GLIMPSES)

    emb, att, raw = image_embedding(image_feat, question_emb, image_dims, params)
    emb, att, raw = jax.block_until_ready((emb, att, raw))
    assert emb.shape == (B, GLIMPSES * D_IMG)
    assert att.shape == (B, K, GLIMPSES)
    assert raw.shape == (B, K, GLIMPSES)

    emb_r, att_r, raw_r = jax.block_until_ready(
        reference(image_feat, question_emb, image_dims, params))

    # bf16 matmul operands + approx EUP reciprocal vs. a pure-f32 reference -> 2e-2 tol.
    np.testing.assert_allclose(np.asarray(raw), np.asarray(raw_r), rtol=2e-2, atol=2e-2)
    np.testing.assert_allclose(np.asarray(att), np.asarray(att_r), rtol=2e-2, atol=2e-2)
    np.testing.assert_allclose(np.asarray(emb), np.asarray(emb_r), rtol=2e-2, atol=2e-2)
    print("KERNEL_OK")
</pallas_src>

<mosaic_0001>
module attributes {stable_mosaic.version = 11 : i64} {
  func.func @_image_attention_kernel(%arg0: i32, %arg1: memref<2xi32, #tpu.memory_space<smem>>, %arg2: memref<1x16x64xbf16, #tpu.memory_space<vmem>>, %arg3: memref<1x1x32xbf16, #tpu.memory_space<vmem>>, %arg4: memref<64x128xbf16, #tpu.memory_space<vmem>>, %arg5: memref<1x128xf32, #tpu.memory_space<vmem>>, %arg6: memref<32x128xbf16, #tpu.memory_space<vmem>>, %arg7: memref<1x128xf32, #tpu.memory_space<vmem>>, %arg8: memref<128x2xbf16, #tpu.memory_space<vmem>>, %arg9: memref<1x2xf32, #tpu.memory_space<vmem>>, %arg10: memref<1x2x64xf32, #tpu.memory_space<vmem>>, %arg11: memref<1x16x2xf32, #tpu.memory_space<vmem>>, %arg12: memref<1x16x2xf32, #tpu.memory_space<vmem>>) attributes {dimension_semantics = [#tpu.dimension_semantics<parallel>], iteration_bounds = array<i64: 2>, scalar_prefetch = 1 : i64, scratch_operands = 0 : i64, tpu.core_type = #tpu.core_type<tc>, window_params = [{transform_indices = @transform_0, window_bounds = array<i64: 1, 16, 64>}, {transform_indices = @transform_1, window_bounds = array<i64: 1, 1, 32>}, {pipeline_mode = #tpu.pipeline_mode<synchronous>, transform_indices = @transform_2, window_bounds = array<i64: 64, 128>}, {pipeline_mode = #tpu.pipeline_mode<synchronous>, transform_indices = @transform_3, window_bounds = array<i64: 1, 128>}, {pipeline_mode = #tpu.pipeline_mode<synchronous>, transform_indices = @transform_4, window_bounds = array<i64: 32, 128>}, {pipeline_mode = #tpu.pipeline_mode<synchronous>, transform_indices = @transform_5, window_bounds = array<i64: 1, 128>}, {pipeline_mode = #tpu.pipeline_mode<synchronous>, transform_indices = @transform_6, window_bounds = array<i64: 128, 2>}, {pipeline_mode = #tpu.pipeline_mode<synchronous>, transform_indices = @transform_7, window_bounds = array<i64: 1, 2>}, {transform_indices = @transform_8, window_bounds = array<i64: 1, 2, 64>}, {transform_indices = @transform_9, window_bounds = array<i64: 1, 16, 2>}, {transform_indices = @transform_10, window_bounds = array<i64: 1, 16, 2>}]} {
    %c0 = arith.constant 0 : index
    %c0_0 = arith.constant 0 : index
    %c0_1 = arith.constant 0 : index
    %0 = vector.load %arg2[%c0, %c0_0, %c0_1] : memref<1x16x64xbf16, #tpu.memory_space<vmem>>, vector<1x16x64xbf16>
    %1 = vector.shape_cast %0 : vector<1x16x64xbf16> to vector<16x64xbf16>
    %c0_2 = arith.constant 0 : index
    %c0_3 = arith.constant 0 : index
    %c0_4 = arith.constant 0 : index
    %2 = vector.load %arg3[%c0_2, %c0_3, %c0_4] : memref<1x1x32xbf16, #tpu.memory_space<vmem>>, vector<1x1x32xbf16>
    %3 = vector.shape_cast %2 : vector<1x1x32xbf16> to vector<1x32xbf16>
    %c0_5 = arith.constant 0 : index
    %c0_6 = arith.constant 0 : index
    %4 = vector.load %arg4[%c0_5, %c0_6] : memref<64x128xbf16, #tpu.memory_space<vmem>>, vector<64x128xbf16>
    %cst = arith.constant dense<0.000000e+00> : vector<16x128xf32>
    %5 = tpu.matmul %1, %4, %cst {dimension_numbers = #tpu.dot_dimension_numbers<[1], [0], [0], [1], [0, 0, 1, 1], [], []>} : vector<16x64xbf16>, vector<64x128xbf16>, vector<16x128xf32> -> vector<16x128xf32>
    %c0_7 = arith.constant 0 : index
    %c0_8 = arith.constant 0 : index
    %6 = vector.load %arg5[%c0_7, %c0_8] : memref<1x128xf32, #tpu.memory_space<vmem>>, vector<1x128xf32>
    %7 = vector.broadcast %6 : vector<1x128xf32> to vector<16x128xf32>
    %8 = arith.addf %5, %7 : vector<16x128xf32>
    %cst_9 = arith.constant 0.000000e+00 : f32
    %9 = vector.broadcast %cst_9 : f32 to vector<16x128xf32>
    %10 = arith.maximumf %8, %9 : vector<16x128xf32>
    %c0_10 = arith.constant 0 : index
    %c0_11 = arith.constant 0 : index
    %11 = vector.load %arg6[%c0_10, %c0_11] : memref<32x128xbf16, #tpu.memory_space<vmem>>, vector<32x128xbf16>
    %cst_12 = arith.constant dense<0.000000e+00> : vector<1x128xf32>
    %12 = tpu.matmul %3, %11, %cst_12 {dimension_numbers = #tpu.dot_dimension_numbers<[1], [0], [0], [1], [0, 0, 1, 1], [], []>} : vector<1x32xbf16>, vector<32x128xbf16>, vector<1x128xf32> -> vector<1x128xf32>
    %c0_13 = arith.constant 0 : index
    %c0_14 = arith.constant 0 : index
    %13 = vector.load %arg7[%c0_13, %c0_14] : memref<1x128xf32, #tpu.memory_space<vmem>>, vector<1x128xf32>
    %14 = arith.addf %12, %13 : vector<1x128xf32>
    %cst_15 = arith.constant 0.000000e+00 : f32
    %15 = vector.broadcast %cst_15 : f32 to vector<1x128xf32>
    %16 = arith.maximumf %14, %15 : vector<1x128xf32>
    %17 = vector.broadcast %16 : vector<1x128xf32> to vector<16x128xf32>
    %18 = arith.mulf %10, %17 : vector<16x128xf32>
    %19 = arith.truncf %18 : vector<16x128xf32> to vector<16x128xbf16>
    %c0_16 = arith.constant 0 : index
    %c0_17 = arith.constant 0 : index
    %20 = vector.load %arg8[%c0_16, %c0_17] : memref<128x2xbf16, #tpu.memory_space<vmem>>, vector<128x2xbf16>
    %cst_18 = arith.constant dense<0.000000e+00> : vector<16x2xf32>
    %21 = tpu.matmul %19, %20, %cst_18 {dimension_numbers = #tpu.dot_dimension_numbers<[1], [0], [0], [1], [0, 0, 1, 1], [], []>} : vector<16x128xbf16>, vector<128x2xbf16>, vector<16x2xf32> -> vector<16x2xf32>
    %c0_19 = arith.constant 0 : index
    %c0_20 = arith.constant 0 : index
    %22 = vector.load %arg9[%c0_19, %c0_20] : memref<1x2xf32, #tpu.memory_space<vmem>>, vector<1x2xf32>
    %23 = vector.broadcast %22 : vector<1x2xf32> to vector<16x2xf32>
    %24 = arith.addf %21, %23 : vector<16x2xf32>
    %c0_21 = arith.constant 0 : index
    %c0_22 = arith.constant 0 : index
    %c0_23 = arith.constant 0 : index
    %25 = vector.load %arg12[%c0_21, %c0_22, %c0_23] : memref<1x16x2xf32, #tpu.memory_space<vmem>>, vector<1x16x2xf32>
    %26 = vector.shape_cast %25 : vector<1x16x2xf32> to vector<16x2xf32>
    %27 = vector.shape_cast %24 : vector<16x2xf32> to vector<1x16x2xf32>
    tpu.vector_store %arg12[%c0_21, %c0_22, %c0_23], %27 {strides = array<i32>} : memref<1x16x2xf32, #tpu.memory_space<vmem>>, vector<1x16x2xf32>,
    %cst_24 = arith.constant dense<0xFF800000> : vector<2xf32>
    %28 = vector.multi_reduction <maximumf>, %24, %cst_24 [0] : vector<16x2xf32> to vector<2xf32>
    %29 = vector.shape_cast %28 : vector<2xf32> to vector<1x2xf32>
    %30 = vector.broadcast %29 : vector<1x2xf32> to vector<16x2xf32>
    %31 = arith.subf %24, %30 : vector<16x2xf32>
    %32 = math.exp %31 : vector<16x2xf32>
    %cst_25 = arith.constant dense<0.000000e+00> : vector<2xf32>
    %33 = vector.multi_reduction <add>, %32, %cst_25 [0] : vector<16x2xf32> to vector<2xf32>
    %34 = vector.shape_cast %33 : vector<2xf32> to vector<1x2xf32>
    %35 = tpu.reciprocal %34 {approx = true} : vector<1x2xf32> -> vector<1x2xf32>
    %36 = vector.broadcast %35 : vector<1x2xf32> to vector<16x2xf32>
    %37 = arith.mulf %32, %36 : vector<16x2xf32>
    %38 = tpu.iota {dimensions = array<i32: 0>} : vector<16x2xi32>
    %39 = arith.index_cast %arg0 : i32 to index
    %40 = memref.load %arg1[%39] : memref<2xi32, #tpu.memory_space<smem>>
    %41 = vector.broadcast %40 : i32 to vector<16x2xi32>
    %42 = arith.cmpi slt, %38, %41 : vector<16x2xi32>
    %cst_26 = arith.constant 0.000000e+00 : f32
    %43 = vector.broadcast %cst_26 : f32 to vector<16x2xf32>
    %44 = arith.select %42, %37, %43 : vector<16x2xi1>, vector<16x2xf32>
    %cst_27 = arith.constant dense<0.000000e+00> : vector<2xf32>
    %45 = vector.multi_reduction <add>, %44, %cst_27 [0] : vector<16x2xf32> to vector<2xf32>
    %46 = vector.shape_cast %45 : vector<2xf32> to vector<1x2xf32>
    %cst_28 = arith.constant 0.000000e+00 : f32
    %47 = vector.broadcast %cst_28 : f32 to vector<1x2xf32>
    %48 = arith.cmpf oeq, %46, %47 : vector<1x2xf32>
    %49 = arith.extui %48 : vector<1x2xi1> to vector<1x2xi32>
    %50 = arith.sitofp %49 : vector<1x2xi32> to vector<1x2xf32>
    %51 = arith.addf %46, %50 : vector<1x2xf32>
    %cst_29 = arith.constant 9.99999993E-9 : f32
    %52 = vector.broadcast %cst_29 : f32 to vector<1x2xf32>
    %53 = arith.addf %51, %52 : vector<1x2xf32>
    %54 = tpu.reciprocal %53 {approx = true} : vector<1x2xf32> -> vector<1x2xf32>
    %55 = vector.broadcast %54 : vector<1x2xf32> to vector<16x2xf32>
    %56 = arith.mulf %44, %55 : vector<16x2xf32>
    %c0_30 = arith.constant 0 : index
    %c0_31 = arith.constant 0 : index
    %c0_32 = arith.constant 0 : index
    %57 = vector.load %arg11[%c0_30, %c0_31, %c0_32] : memref<1x16x2xf32, #tpu.memory_space<vmem>>, vector<1x16x2xf32>
    %58 = vector.shape_cast %57 : vector<1x16x2xf32> to vector<16x2xf32>
    %59 = vector.shape_cast %56 : vector<16x2xf32> to vector<1x16x2xf32>
    tpu.vector_store %arg11[%c0_30, %c0_31, %c0_32], %59 {strides = array<i32>} : memref<1x16x2xf32, #tpu.memory_space<vmem>>, vector<1x16x2xf32>,
    %60 = arith.truncf %56 : vector<16x2xf32> to vector<16x2xbf16>
    %cst_33 = arith.constant dense<0.000000e+00> : vector<2x64xf32>
    %61 = tpu.matmul %60, %1, %cst_33 {dimension_numbers = #tpu.dot_dimension_numbers<[0], [0], [1], [1], [0, 1, 1, 1], [], []>} : vector<16x2xbf16>, vector<16x64xbf16>, vector<2x64xf32> -> vector<2x64xf32>
    %c0_34 = arith.constant 0 : index
    %c0_35 = arith.constant 0 : index
    %c0_36 = arith.constant 0 : index
    %62 = vector.load %arg10[%c0_34, %c0_35, %c0_36] : memref<1x2x64xf32, #tpu.memory_space<vmem>>, vector<1x2x64xf32>
    %63 = vector.shape_cast %62 : vector<1x2x64xf32> to vector<2x64xf32>
    %64 = vector.shape_cast %61 : vector<2x64xf32> to vector<1x2x64xf32>
    tpu.vector_store %arg10[%c0_34, %c0_35, %c0_36], %64 {strides = array<i32>} : memref<1x2x64xf32, #tpu.memory_space<vmem>>, vector<1x2x64xf32>,
    return
  }
  func.func @transform_0(%arg0: i32, %arg1: memref<2xi32, #tpu.memory_space<smem>>) -> (i32, i32, i32) {
    %c0_i32 = arith.constant 0 : i32
    %c0_i32_0 = arith.constant 0 : i32
    %c0_i32_1 = arith.constant 0 : i32
    return %arg0, %c0_i32, %c0_i32_0 : i32, i32, i32
  }
  func.func @transform_1(%arg0: i32, %arg1: memref<2xi32, #tpu.memory_space<smem>>) -> (i32, i32, i32) {
    %c0_i32 = arith.constant 0 : i32
    %c0_i32_0 = arith.constant 0 : i32
    %c0_i32_1 = arith.constant 0 : i32
    return %arg0, %c0_i32, %c0_i32_0 : i32, i32, i32
  }
  func.func @transform_2(%arg0: i32, %arg1: memref<2xi32, #tpu.memory_space<smem>>) -> (i32, i32) {
    %c0_i32 = arith.constant 0 : i32
    %c0_i32_0 = arith.constant 0 : i32
    %c0_i32_1 = arith.constant 0 : i32
    return %c0_i32, %c0_i32_0 : i32, i32
  }
  func.func @transform_3(%arg0: i32, %arg1: memref<2xi32, #tpu.memory_space<smem>>) -> (i32, i32) {
    %c0_i32 = arith.constant 0 : i32
    %c0_i32_0 = arith.constant 0 : i32
    %c0_i32_1 = arith.constant 0 : i32
    return %c0_i32, %c0_i32_0 : i32, i32
  }
  func.func @transform_4(%arg0: i32, %arg1: memref<2xi32, #tpu.memory_space<smem>>) -> (i32, i32) {
    %c0_i32 = arith.constant 0 : i32
    %c0_i32_0 = arith.constant 0 : i32
    %c0_i32_1 = arith.constant 0 : i32
    return %c0_i32, %c0_i32_0 : i32, i32
  }
  func.func @transform_5(%arg0: i32, %arg1: memref<2xi32, #tpu.memory_space<smem>>) -> (i32, i32) {
    %c0_i32 = arith.constant 0 : i32
    %c0_i32_0 = arith.constant 0 : i32
    %c0_i32_1 = arith.constant 0 : i32
    return %c0_i32, %c0_i32_0 : i32, i32
  }
  func.func @transform_6(%arg0: i32, %arg1: memref<2xi32, #tpu.memory_space<smem>>) -> (i32, i32) {
    %c0_i32 = arith.constant 0 : i32
    %c0_i32_0 = arith.constant 0 : i32
    %c0_i32_1 = arith.constant 0 : i32
    return %c0_i32, %c0_i32_0 : i32, i32
  }
  func.func @transform_7(%arg0: i32, %arg1: memref<2xi32, #tpu.memory_space<smem>>) -> (i32, i32) {
    %c0_i32 = arith.constant 0 : i32
    %c0_i32_0 = arith.constant 0 : i32
    %c0_i32_1 = arith.constant 0 : i32
    return %c0_i32, %c0_i32_0 : i32, i32
  }
  func.func @transform_8(%arg0: i32, %arg1: memref<2xi32, #tpu.memory_space<smem>>) -> (i32, i32, i32) {
    %c0_i32 = arith.constant 0 : i32
    %c0_i32_0 = arith.constant 0 : i32
    %c0_i32_1 = arith.constant 0 : i32
    return %arg0, %c0_i32, %c0_i32_0 : i32, i32, i32
  }
  func.func @transform_9(%arg0: i32, %arg1: memref<2xi32, #tpu.memory_space<smem>>) -> (i32, i32, i32) {
    %c0_i32 = arith.constant 0 : i32
    %c0_i32_0 = arith.constant 0 : i32
    %c0_i32_1 = arith.constant 0 : i32
    return %arg0, %c0_i32, %c0_i32_0 : i32, i32, i32
  }
  func.func @transform_10(%arg0: i32, %arg1: memref<2xi32, #tpu.memory_space<smem>>) -> (i32, i32, i32) {
    %c0_i32 = arith.constant 0 : i32
    %c0_i32_0 = arith.constant 0 : i32
    %c0_i32_1 = arith.constant 0 : i32
    return %arg0, %c0_i32, %c0_i32_0 : i32, i32, i32
  }
}

</mosaic_0001>

<bundles_post_ra>
// kernel: tpu_custom_call.1
= control target key start
LH: loop header
LB: loop body
LE: loop exit
PB: predicated region body
PF: predicated region fallthrough
CT: control target
= control target key end

     0   :  { %s1064_s20 = smov [#allocation3]   ;;  %s1294_s0 = inlined_call_operand.vmem [shape: s32[2], index: 0, kind: input, shape index: {}]   ;;  %s1295_s1 = inlined_call_operand.vmem [shape: bf16[2,16,64], index: 1, kind: input, shape index: {}]   ;;  %s1296_s2 = inlined_call_operand.vmem [shape: bf16[2,1,32], index: 2, kind: input, shape index: {}]   ;;  %s1297_s3 = inlined_call_operand.vmem [shape: bf16[64,128], index: 3, kind: input, shape index: {}]   ;;  %s1298_s4 = inlined_call_operand.vmem [shape: f32[1,128], index: 4, kind: input, shape index: {}]   ;;  %s1299_s5 = inlined_call_operand.vmem [shape: bf16[32,128], index: 5, kind: input, shape index: {}]   ;;  %s1300_s6 = inlined_call_operand.vmem [shape: f32[1,128], index: 6, kind: input, shape index: {}]   ;;  %s1301_s7 = inlined_call_operand.vmem [shape: bf16[128,2], index: 7, kind: input, shape index: {}]   ;;  %s1302_s8 = inlined_call_operand.vmem [shape: f32[1,2], index: 8, kind: input, shape index: {}]   ;;  %s1303_s9 = inlined_call_operand.hbm [shape: f32[2,2,64], index: 9, kind: output, shape index: {0}]   ;;  %s1304_s10 = inlined_call_operand.vmem [shape: f32[2,16,2], index: 10, kind: output, shape index: {1}]   ;;  %s1305_s11 = inlined_call_operand.vmem [shape: f32[2,16,2], index: 11, kind: output, shape index: {2}]  }
   0x1   :  { %1306 = sst [smem:[#allocation9_spill]] %s1299_s5  ;;  %s18_s19 = sshll.u32 %s1294_s0, 4  ;;  %s19_s19 = int_to_ptr.vmem [resolvable:$true] %s18_s19 }
   0x2   :  { %21 = dma.vmem_to_smem %s19_s19, 16, %s1064_s20, [#allocation2] }
   0x3   :  { %1042 = dma.done.wait [#allocation2], 16 }
   0x4   :  { %1043 = vsyncadd [#allocation2], 4294967280 }
   0x5   :  { %24 = sfence }
   0x6   :  { %25 = vsyncpa [#allocation5], 0 }
   0x7   :  { %27 = vsyncpa [#allocation5 + $0x1], 0  ;;  %s1129_s21 = smov 0   ;;  %s1131_s22 = smov 0  }
   0x8   :  { %s1133_s23 = smov 0   ;;  %s1135_s24 = smov 0  }
   0x9 LB: > { %s1150_s0 = sadd.s32 4294967295, %s1062_s24   ;;  %s837_s25 = sadd.s32 4294967294, %s1062_s24   ;;  %s1062_s24 = sphi %s1135_s24, %s1315_s24   ;;  %s1058_s23 = sphi %s1133_s23, %s1314_s23   ;;  %s1054_s22 = sphi %s1131_s22, %s1313_s22   ;;  %s1050_s21 = sphi %s1129_s21, %s1312_s21  }
   0xa   : > { %s1154_s26 = sadd.s32 1, %s1062_s24   ;;  %s218_s27 = sadd.s32 1, %s1058_s23 }
   0xb   : > { %s215_s28 = ssub.s32 %s1062_s24, %s1154_s26  ;;  %p228_p0 = scmp.ne.s32.totalorder %s1058_s23, %s1054_s22 }
   0xc   : > { %p216_p1 = scmp.eq.s32.totalorder %s215_s28, 0  ;;  %p229_p2 = scmp.eq.s32.totalorder %s1150_s0, 1 }
   0xd   : > { %p234_p3 = scmp.ne.s32.totalorder %s1054_s22, %s1050_s21  ;;  %p235_p4 = scmp.eq.s32.totalorder %s837_s25, 1 }
   0xe   : > { %s1165_s29 = scalar_select %p216_p1, %s1058_s23, %s218_s27  }
   0xf   : > { %p1167_p5 = por %p229_p2, %p228_p0  ;;  %p1171_p6 = por %p235_p4, %p234_p3 }
  0x10   : > { %1307 = sst [smem:[#allocation8_spill]] %s1165_s29  ;;  %p840_p7 = scmp.ge.s32.totalorder %s1062_s24, 1 }
  0x11   : > { %p337_p8 = scmp.lt.s32.totalorder %s1062_s24, 3 }
  0x13   : > { %p338_p9 = pnand %p840_p7, %p337_p8 }
  0x14   : > { %s1310_s5 = sld [smem:[#allocation9_spill]] (!%p338_p9)  ;;  %p388_p10 = scmp.lt.s32.totalorder (!%p338_p9), %s1150_s0, 1 }
  0x15   : > { %341 = sbr.rel (%p338_p9) target bundleno = 723 (0x2d3), region = 52  ;;  %s625_s28 = sld [smem:[#allocation3 + %s1150_s0]] (!%p338_p9) }
  0x16   : > { %s371_s29 = sand.u32 (!%p338_p9), 1, %s1054_s22  }
  0x1a   : > { %v923_v0 = vld [vmem:[%s1297_s3 + $0x18] sm:$0xff]  ;;  %v925_v1 = vld [vmem:[%s1310_s5 + $0x8] sm:$0xff]  ;;  %v922_v2 = vld [vmem:[%s1297_s3 + $0x10] sm:$0xff]  ;;  %s1191_s25 = scalar_select %p388_p10, %s1150_s0, 1  ;;  %vm488_vm0 = vcmask 261120   ;;  %vm451_vm1 = vcmask 523264   ;;  %v622_v59 = vlaneseq }
  0x1b   : > { %459 = vmatpush.bf16.msra.mxu0 %v923_v0  ;;  %498 = vmatpush.bf16.msra.mxu1 %v925_v1  ;;  %v924_v3 = vld [vmem:[%s1310_s5] sm:$0xff]  ;;  %v933_v4 = vld [vmem:[%s1301_s7 + $0x38] sm:$0xff]  ;;  %v932_v5 = vld [vmem:[%s1301_s7 + $0x30] sm:$0xff]  ;;  %vm592_vm2 = vcmask 15360   ;;  %v626_v0 = vstv %s625_s28  ;;  %vm668_vm6 = vcmask 130048   ;;  %vm685_vm7 = vcmask 517120  }
  0x1c   : > { %s395_s15 = scalar_lea.vmem %s1296_s2, %s1191_s25  ;;  %s916_s16 = sshll.u32 %s1191_s25, 3  ;;  %578 = vmatpush.bf16.msra.mxu2 %v933_v4  ;;  %v921_v6 = vld [vmem:[%s1297_s3 + $0x8] sm:$0xff]  ;;  %v920_v10 = vld [vmem:[%s1297_s3] sm:$0xff]  ;;  %v929_v12 = vld [vmem:[%s1301_s7 + $0x18] sm:$0xff]  ;;  %v623_v62 = vshrl.u32 %v622_v59, 7 }
  0x1d   : > { %s392_s5 = scalar_lea.vmem %s1295_s1, %s916_s16  ;;  %v409_v7 = vld [vmem:[%s395_s15] sm:$0x1]  ;;  %v931_v9 = vld [vmem:[%s1301_s7 + $0x28] sm:$0xff]  ;;  %v928_v13 = vld [vmem:[%s1301_s7 + $0x10] sm:$0xff]  ;;  %s913_s15 = sshll.u32 %s1150_s0, 1 }
  0x1e   : > { %v919_v8 = vld [vmem:[%s392_s5] sm:$0xff]  ;;  %v927_v14 = vld [vmem:[%s1301_s7 + $0x8] sm:$0xff]  ;;  %s917_s5 = sshll.u32 %s1191_s25, 4  ;;  %v624_v63 = vadd.s32 8, %v623_v62  ;;  %vm627_vm3 = vcmp.lt.s32.totalorder %v623_v62, %v626_v0  ;;  %s841_s16 = sshll.u32 %s371_s29, 1 }
  0x1f   : > { %460 = vmatpush.bf16.msra.mxu0 %v922_v2  ;;  %499 = vmatpush.bf16.msra.mxu1 %v924_v3  ;;  %v930_v11 = vld [vmem:[%s1301_s7 + $0x20] sm:$0xff]  ;;  %s405_s27 = scalar_lea.vmem %s1305_s11, %s917_s5  ;;  %s400_s17 = scalar_lea.vmem %s1304_s10, %s917_s5 }
  0x20   : > { %579 = vmatpush.bf16.msra.mxu2 %v932_v5  ;;  %679 = vmatpush.bf16.msra.mxu3 %v919_v8  ;;  %v926_v15 = vld [vmem:[%s1301_s7] sm:$0xff]  ;;  %vm628_vm4 = vcmp.lt.s32.totalorder %v624_v63, %v626_v0  ;;  %s708_s19 = scalar_lea.hbm %s1303_s9, %s913_s15  ;;  %s373_s5 = scalar_lea.vmem [#allocation4], %s841_s16 }
  0x21   : > { %v475_v17 = vld [vmem:[%s1300_s6] sm:$0x1]  ;;  %s710_s20 = sshll.u32 %s373_s5, 4  ;;  %s688_s28 = scalar_lea.sflag [#allocation5], %s371_s29  ;;  %s711_s20 = int_to_ptr.vmem [resolvable:$true] %s710_s20 }
  0x22   : > { %877 = vmatmul.msk.bf16.vlgmr.msra.gmra.mxu1 %vm488_vm0, %v409_v7  ;;  %v976_v21 = vld [vmem:[%s1298_s4] ss:$0 sm:$0xff]  ;;  %s1018_s15 = scalar_lea.hbm %s1303_s9, 4 }
  0x23   : > { %461 = vmatpush.bf16.msra.mxu0 %v921_v6  ;;  %v977_v32 = vld [vmem:[%s1302_s8] ss:$0 sm:$0xff] }
  0x24   : > { %580 = vmatpush.bf16.msra.mxu2 %v931_v9 }
  0x27   : > { %462 = vmatpush.bf16.msra.mxu0 %v920_v10 }
  0x28   : > { %581 = vmatpush.bf16.msra.mxu2 %v930_v11 }
  0x2a   : > { %868 = vmatmul.msk.bf16.vlgmr.msra.gmra.mxu0 %vm451_vm1, %v919_v8 }
  0x2c   : > { %582 = vmatpush.bf16.msra.mxu2 %v929_v12 }
  0x30   : > { %583 = vmatpush.bf16.msra.mxu2 %v928_v13 }
  0x34   : > { %584 = vmatpush.bf16.msra.mxu2 %v927_v14 }
  0x38   : > { %585 = vmatpush.bf16.msra.mxu2 %v926_v15  ;;  %v1065_v15 = vmov 0.0  }
  0x9f   : > { %v501_v16 = vpop.f32.mrf.mxu1 }
  0xa0   : > { %v502_v20 = vadd.f32 %v501_v16, %v475_v17 }
  0xa2   : > { %v505_v22 = vmax.f32 %v502_v20, 0.0 }
  0xa4   : > { %v506_v25 = vperm.slane %v505_v22, 0 }
  0xa7   : > { %v464_v18 = vpop.f32.mrf.mxu0  ;;  %v503_v19 = vpop.f32.mrf.mxu1 }
  0xa8   : > { %v465_v23 = vadd.f32 %v976_v21, %v464_v18 }
  0xaa   : > { %v469_v26 = vmax.f32 %v465_v23, 0.0 }
  0xac   : > { %v507_v29 = vmul.f32 %v506_v25, %v469_v26 }
  0xaf   : > { %v466_v24 = vpop.f32.mrf.mxu0 }
  0xb0   : > { %v467_v27 = vadd.f32 %v976_v21, %v466_v24 }
  0xb2   : > { %v470_v28 = vmax.f32 %v467_v27, 0.0 }
  0xb4   : > { %v508_v30 = vmul.f32 %v506_v25, %v470_v28 }
  0xb6   : > { %v509_v31 = vpack.c.bf16 %v508_v30, %v507_v29 }
  0xb8   : > { %586 = vmatmul.bf16.vlgmr.msra.gmra.mxu2 %v509_v31 }
 0x13b   : > { %v587_v33 = vpop.f32.mrf.mxu2 }
 0x13c   : > { %v588_v34 = vadd.f32 %v977_v32, %v587_v33 }
 0x13e   : > { %593 = vst.msk [vmem:[%s405_s27] sm:$0xff] %vm592_vm2, %v588_v34  ;;  %v595_v37 = vsel %vm592_vm2, %v588_v34, -inf }
 0x143   : > { %v589_v35 = vpop.f32.mrf.mxu2 }
 0x144   : > { %v590_v36 = vadd.f32 %v977_v32, %v589_v35 }
 0x146   : > { %594 = vst.msk [vmem:[%s405_s27 + $0x8] sm:$0xff] %vm592_vm2, %v590_v36  ;;  %v596_v38 = vsel %vm592_vm2, %v590_v36, -inf  ;;  %s712_s27 = sshll.u32 %s708_s19, 4  ;;  %s713_s27 = int_to_ptr.hbm [resolvable:$true] %s712_s27 }
 0x147   : > { %v597_v39 = vmax.f32 %v595_v37, %v596_v38  ;;  %s1012_s13 = sshra.s32 %s713_s27, 4  ;;  %s1013_s13 = int_to_ptr.hbm [resolvable:$true] %s1012_s13 }
 0x148   : > { %s1014_s14 = scalar_lea.hbm %s1013_s13, 2  ;;  %p1019_p0 = scmp.lt.s32.totalorder %s1013_s13, %s1303_s9 }
 0x149   : > { %v598_v40 = vrot.slane %v597_v39, 4  ;;  %p1015_p11 = scmp.ne.s32.totalorder %s1013_s13, %s1014_s14  ;;  %p1020_p1 = scmp.lt.s32.totalorder %s1018_s15, %s1014_s14 }
 0x14b   : > { %v599_v41 = vmax.f32 %v597_v39, %v598_v40  ;;  %p1016_p12 = pnand %p1015_p11, %p1167_p5  ;;  %p1021_p2 = por %p1020_p1, %p1019_p0 }
 0x14d   : > { %v600_v42 = vrot.slane %v599_v41, 2  ;;  %p1017_p13 = pneg %p1016_p12 }
 0x14f   : > { %v601_v43 = vmax.f32 %v599_v41, %v600_v42  ;;  %p1022_p3 = pnand %p1021_p2, %p1017_p13 }
 0x151   : > { %v602_v44 = vrot.slane %v601_v43, 1 }
 0x153   : > { %v603_v45 = vmax.f32 %v601_v43, %v602_v44 }
 0x155   : > { %v604_v46 = vsub.f32 %v588_v34, %v603_v45  ;;  %v605_v47 = vsub.f32 %v590_v36, %v603_v45 }
 0x157   : > { %v606_v48 = vmul.f32 1.442695, %v604_v46  ;;  %v608_v49 = vmul.f32 1.442695, %v605_v47 }
 0x159   : > { %978 = vpow2.f32 %v606_v48 }
 0x15a   : > { %980 = vpow2.f32 %v608_v49 }
 0x15f   : > { %v979_v50 = vpop.eup %978 }
 0x160   : > { %v981_v51 = vpop.eup %980  ;;  %v610_v52 = vsel %vm592_vm2, %v979_v50, 0.0 }
 0x161   : > { %v611_v53 = vsel %vm592_vm2, %v981_v51, 0.0 }
 0x162   : > { %v612_v54 = vadd.f32 %v611_v53, %v610_v52 }
 0x164   : > { %v613_v55 = vrot.slane %v612_v54, 4 }
 0x166   : > { %v614_v56 = vadd.f32 %v613_v55, %v612_v54 }
 0x168   : > { %v615_v57 = vrot.slane %v614_v56, 2 }
 0x16a   : > { %v616_v58 = vadd.f32 %v615_v57, %v614_v56 }
 0x16c   : > { %v617_v60 = vrot.slane %v616_v58, 1 }
 0x16e   : > { %v618_v61 = vadd.f32 %v617_v60, %v616_v58 }
 0x170   : > { %982 = vrcp.f32 %v618_v61 }
 0x176   : > { %v983_v1 = vpop.eup %982 }
 0x177   : > { %v620_v2 = vmul.f32 %v983_v1, %v979_v50  ;;  %v621_v3 = vmul.f32 %v983_v1, %v981_v51 }
 0x179   : > { %v629_v4 = vsel %vm627_vm3, %v620_v2, 0.0  ;;  %v630_v5 = vsel %vm628_vm4, %v621_v3, 0.0 }
 0x17a   : > { %v631_v6 = vsel %vm592_vm2, %v629_v4, 0.0  ;;  %v632_v7 = vsel %vm592_vm2, %v630_v5, 0.0 }
 0x17b   : > { %v633_v8 = vadd.f32 %v632_v7, %v631_v6 }
 0x17d   : > { %v634_v9 = vrot.slane %v633_v8, 4 }
 0x17f   : > { %v635_v10 = vadd.f32 %v634_v9, %v633_v8 }
 0x181   : > { %v636_v11 = vrot.slane %v635_v10, 2 }
 0x183   : > { %v637_v12 = vadd.f32 %v636_v11, %v635_v10 }
 0x185   : > { %v638_v13 = vrot.slane %v637_v12, 1 }
 0x187   : > { %v639_v14 = vadd.f32 %v638_v13, %v637_v12 }
 0x189   : > { %vm640_vm5 = vcmp.eq.f32.partialorder %v639_v14, 0.0 }
 0x18a   : > { %v910_v16 = vsel %vm640_vm5, 1.0, %v1065_v15 }
 0x18b   : > { %v643_v17 = vadd.f32 %v910_v16, %v639_v14 }
 0x18d   : > { %v644_v18 = vadd.f32 1e-08, %v643_v17 }
 0x18f   : > { %984 = vrcp.f32 %v644_v18 }
 0x195   : > { %v985_v19 = vpop.eup %984 }
 0x196   : > { %v646_v20 = vmul.f32 %v985_v19, %v629_v4  ;;  %v647_v21 = vmul.f32 %v985_v19, %v630_v5 }
 0x198   : > { %649 = vst.msk [vmem:[%s400_s17 + $0x8] sm:$0xff] %vm592_vm2, %v647_v21  ;;  %v650_v22 = vpack.c.bf16 %v647_v21, %v646_v20 }
 0x199   : > { %648 = vst.msk [vmem:[%s400_s17] sm:$0xff] %vm592_vm2, %v646_v20 }
 0x19a   : > { %651 = vxpose.xlu0.c.b16.start.end [1/1] (short) (narrow) %v650_v22, 16 }
 0x246   : > { %v659_v23 = vpop.trf.xlu0 }
 0x247   : > { %911 = vmatmul.msk.bf16.vlgmr.msra.gmra.mxu3 %vm668_vm6, %v659_v23 }
 0x2ca   : > { %v681_v24 = vpop.f32.mrf.mxu3 }
 0x2cb   : > { %686 = vst.msk [vmem:[%s373_s5] sm:$0x3] %vm685_vm7, %v681_v24 }
 0x2cc   : > { %1025 = shalt.err (!%p1022_p3)
}
 0x2cd   : > { %934 = dma.vmem_to_hbm [thread:$0]  (%p1167_p5), %s711_s20, 32, %s713_s27, %s688_s28  }
 0x2d2   : > { %v683_v25 = vpop.f32.mrf.mxu3 }
 0x2d3 PF: > { %p940_p4 = scmp.ge.s32.totalorder %s1062_s24, 2  ;;  %s730_s29 = sand.u32 1, %s1050_s21  }
 0x2d4   : > { %s731_s18 = scalar_lea.sflag [#allocation5], %s730_s29 }
 0x2d5   : > { %p937_p7 = pnand %p940_p4, %p1171_p6 }
 0x2d7   : > { %p938_p8 = pneg %p937_p7 }
 0x2d9   : > { %1045 = dma.done.wait (%p938_p8), %s731_s18, 32  }
 0x2da   : > { %1047 = vsyncadd (%p938_p8), %s731_s18, 4294967264  ;;  %s1311_s19 = sld [smem:[#allocation8_spill]]  ;;  %p30_p9 = scmp.ge.s32.totalorder %s1154_s26, 4  }
 0x2db   : > { %s1312_s21 = smov %s1054_s22  ;;  %s1313_s22 = smov %s1058_s23 }
 0x2dc   : > { %s1315_s24 = smov %s1154_s26  ;;  %32 = sbr.rel (!%p30_p9) target bundleno = 9 (0x9), region = 114 }
 0x2e0   : > { %s1314_s23 = smov %s1311_s19 }
 0x2e1   :  { %753 = vsyncpa [#allocation5], 1 }
 0x2e2   :  { %755 = vsyncpa [#allocation5 + $0x1], 1 }

</bundles_post_ra>
